<compile_context>
chip_gen: v6e
topology: v6e:2x2x1
jax: 0.10.0
libtpu: 0.0.40
codegen_flags: <defaults>
</compile_context>

<pallas_src>
import jax
import jax.numpy as jnp
from jax import lax
from jax.experimental import pallas as pl
from jax.experimental.pallas import tpu as pltpu


def _round_up(v: int, m: int) -> int:
    return ((v + m - 1) // m) * m


def _make_cosface_kernel(s: float, m: float, ls: float,
                         b_real: int, c_real: int,
                         tile_b: int, tile_c: int, has_tail: bool):
    s = float(s)
    m = float(m)
    ls = float(ls)
    sm = s * m

    def kernel(x_ref, y_ref, w_ref, cmeta_ref, v_ref, out_ref,
               xs_ref, max_ref, den_ref, tgt_ref, slog_ref):
        i = pl.program_id(0)            # batch block
        j = pl.program_id(1)            # class tile
        nj = pl.num_programs(1)

        # ---- once per batch block: pre-scaled x + analytic sum + init ------
        @pl.when(j == 0)
        def _init():
            x32 = x_ref[...].astype(jnp.float32)                  # (tb, D)
            sumsq = jnp.sum(x32 * x32, axis=1, keepdims=True)     # (tb, 1)
            # F.normalize(x, dim=1) with eps=1e-12, s folded in.
            row_scale = s * lax.rsqrt(jnp.maximum(sumsq, 1e-24))
            xs = x32 * row_scale                                  # s * x/||x||
            xs_ref[...] = xs.astype(xs_ref.dtype)
            # sum_c logits_i = (s/||x_i||) * x_i . v  - s*m   (margin at y_i)
            slog_ref[...] = jnp.sum(xs * v_ref[...], axis=1, keepdims=True) - sm
            max_ref[...] = jnp.full((tile_b, 1), -jnp.inf, jnp.float32)
            den_ref[...] = jnp.zeros((tile_b, 1), jnp.float32)
            tgt_ref[...] = jnp.zeros((tile_b, 1), jnp.float32)

        # ---- per class tile -------------------------------------------------
        col_inv = cmeta_ref[0:1, :]                                # (1, tc) 1/||w_c||
        raw = jnp.dot(xs_ref[...], w_ref[...],
                      preferred_element_type=jnp.float32)          # MXU, f32 acc
        logits = raw * col_inv                                     # s * cos_theta

        # target mask from a (1, tc) iota (no (tb, tc) int32 materialization)
        col_local = lax.broadcasted_iota(jnp.int32, (1, tile_c), 1)
        is_tgt = col_local == (y_ref[...] - j * tile_c)            # (tb, tc) bool
        logits = logits - jnp.where(is_tgt, sm, 0.0)               # additive margin

        if has_tail:
            # 0 on valid columns, -inf on padded tail columns (interior tiles
            # add zeros; statically removed when C % tile_c == 0).
            lse_logits = logits + cmeta_ref[1:2, :]
        else:
            lse_logits = logits

        # streaming log-sum-exp over class tiles
        tile_max = jnp.max(lse_logits, axis=1, keepdims=True)
        m_new = jnp.maximum(max_ref[...], tile_max)
        alpha = jnp.exp(max_ref[...] - m_new)
        p = jnp.exp(lse_logits - m_new)
        den_ref[...] = alpha * den_ref[...] + jnp.sum(p, axis=1, keepdims=True)
        max_ref[...] = m_new

        # gathered (margined) target logit
        tgt_ref[...] += jnp.sum(jnp.where(is_tgt, logits, 0.0),
                                axis=1, keepdims=True)

        # ---- finalize: label-smoothed cross entropy -------------------------
        @pl.when(j == nj - 1)
        def _finalize():
            lse = max_ref[...] + jnp.log(den_ref[...])
            # loss_i = lse - (1-ls)*logit_target - (ls/C) * sum_c logits
            per_row = (lse
                       - (1.0 - ls) * tgt_ref[...]
                       - (ls / float(c_real)) * slog_ref[...])
            row_ids = i * tile_b + lax.broadcasted_iota(
                jnp.int32, (tile_b, 1), 0)
            per_row = jnp.where(row_ids < b_real, per_row, 0.0)
            out_ref[...] = per_row / float(b_real)

    return kernel


def cosface_loss(x, y, w, s=64.0, m=0.35, label_smoothing=0.1,
                 tile_b=256, tile_c=2048, stream_dtype=jnp.bfloat16,
                 w_buffers=2, min_batch_blocks=1):
    """x: (B, feat_dim); y: (B,) int; w: (feat_dim, num_class).

    Per-chip guidance (defaults target v6e/v7x):
      v6e: tile_b=256, tile_c=2048
      v7x: tile_b=256, tile_c=1024, min_batch_blocks=2 for small batches
      v5e: tile_b=128, tile_c=4096, w_buffers=3 (DMA-bound W stream)
    """
    B, D = x.shape
    Dw, C = w.shape
    assert Dw == D, "feature dims of x and w must match"

    # Batch tiling: multiple of 8 sublanes, capped to the (padded) batch.
    b8 = _round_up(B, 8)
    tile_b = max(8, (min(int(tile_b), b8) // 8) * 8)
    if int(min_batch_blocks) > 1:
        # Give each TensorCore (v7x megacore) at least one batch block.
        per_block = _round_up(-(-b8 // int(min_batch_blocks)), 8)
        tile_b = max(8, min(tile_b, per_block))
    b_pad = _round_up(B, tile_b)

    # Class tiling: multiple of 128 lanes, capped to the (padded) class count.
    tile_c = max(128, (int(tile_c) // 128) * 128)
    tile_c = min(tile_c, _round_up(C, 128))
    c_pad = _round_up(C, tile_c)
    has_tail = (c_pad != C)

    n_b = b_pad // tile_b
    n_c = c_pad // tile_c

    # ---- inputs --------------------------------------------------------------
    # x stays in its native dtype (norms computed in f32 in-kernel).
    if b_pad == B:
        x_p = x
    else:
        x_p = jnp.zeros((b_pad, D), x.dtype).at[:B].set(x)
    y_p = jnp.full((b_pad, 1), -1, jnp.int32).at[:B, 0].set(y.astype(jnp.int32))

    # W: avoid any copy when already in stream dtype and no padding needed;
    # otherwise the zero-pad is fused into the (unavoidable) cast pass.
    if c_pad == C:
        w_p = w if w.dtype == stream_dtype else w.astype(stream_dtype)
    else:
        w_p = jnp.zeros((D, c_pad), stream_dtype).at[:, :C].set(
            w.astype(stream_dtype))

    # Precomputed per-column data (tiny): 1/||w_c|| (0 on padded columns),
    # the 0/-inf LSE tail bias, and v = sum_c w_c/||w_c|| for the analytic
    # label-smoothing sum.  Computed from the same bf16 W the kernel streams.
    col_ids = jnp.arange(c_pad)
    valid = col_ids < C
    col_sumsq = jnp.sum(jnp.square(w_p.astype(jnp.float32)), axis=0)
    col_inv = jnp.where(valid, lax.rsqrt(jnp.maximum(col_sumsq, 1e-24)), 0.0)
    col_bias = jnp.where(valid, 0.0, -jnp.inf)
    col_meta = jnp.stack([col_inv, col_bias], axis=0).astype(jnp.float32)  # (2, c_pad)
    v_row = jnp.sum(w_p.astype(jnp.float32) * col_inv[None, :],
                    axis=1).reshape(1, D).astype(jnp.float32)              # (1, D)

    kernel = _make_cosface_kernel(s, m, label_smoothing, B, C,
                                  tile_b, tile_c, has_tail)

    # W stream spec (optionally deeper-buffered for DMA-bound v5e).
    if w_buffers is not None and int(w_buffers) > 2:
        w_spec = pl.BlockSpec((D, tile_c), lambda i, j: (0, j),
                              pipeline_mode=pl.Buffered(int(w_buffers)))
    else:
        w_spec = pl.BlockSpec((D, tile_c), lambda i, j: (0, j))

    grid_spec = pltpu.PrefetchScalarGridSpec(
        num_scalar_prefetch=0,
        grid=(n_b, n_c),
        in_specs=[
            pl.BlockSpec((tile_b, D), lambda i, j: (i, 0)),   # x: fetched once per batch block
            pl.BlockSpec((tile_b, 1), lambda i, j: (i, 0)),   # y
            w_spec,                                           # w: streamed class tiles
            pl.BlockSpec((2, tile_c), lambda i, j: (0, j)),   # col_inv / tail bias
            pl.BlockSpec((1, D), lambda i, j: (0, 0)),        # v (analytic smoothing sum)
        ],
        out_specs=pl.BlockSpec((tile_b, 1), lambda i, j: (i, 0)),
        scratch_shapes=[
            pltpu.VMEM((tile_b, D), stream_dtype),   # pre-scaled x (resident)
            pltpu.VMEM((tile_b, 1), jnp.float32),    # running max
            pltpu.VMEM((tile_b, 1), jnp.float32),    # running softmax denominator
            pltpu.VMEM((tile_b, 1), jnp.float32),    # target logit
            pltpu.VMEM((tile_b, 1), jnp.float32),    # analytic sum of logits
        ],
    )

    # VMEM budget: double-buffered W stream + x + f32 tile temporaries.
    # Capped at 48 MiB so v7x (64 MiB/TC) keeps headroom for Mosaic scratch.
    esz_w = jnp.dtype(stream_dtype).itemsize
    esz_x = jnp.dtype(x_p.dtype).itemsize
    need = (2 * D * tile_c * esz_w
            + 2 * tile_b * D * esz_x
            + tile_b * D * esz_w
            + 2 * 8 * tile_c * 4
            + 8 * tile_b * tile_c * 4
            + (4 << 20))
    vmem_limit = int(min(max(need, 16 << 20), 48 << 20))

    out = pl.pallas_call(
        kernel,
        grid_spec=grid_spec,
        out_shape=jax.ShapeDtypeStruct((b_pad, 1), jnp.float32),
        compiler_params=pltpu.CompilerParams(
            dimension_semantics=("parallel", "arbitrary"),
            vmem_limit_bytes=vmem_limit,
        ),
    )(x_p, y_p, w_p, col_meta, v_row)

    # per-row contributions are already divided by the true batch size.
    return jnp.sum(out)


def _reference_loss(x, y, w, s, m, ls, stream_dtype=jnp.bfloat16):
    """Pure-JAX reference of the PyTorch forward, mimicking the kernel's
    quantization points (w streamed as bf16; x scaled by s/||x|| then bf16)."""
    w32 = w.astype(stream_dtype).astype(jnp.float32)
    wn = w32 / jnp.maximum(jnp.linalg.norm(w32, axis=0, keepdims=True), 1e-12)
    xs = s * x / jnp.maximum(jnp.linalg.norm(x, axis=1, keepdims=True), 1e-12)
    xs = xs.astype(stream_dtype).astype(jnp.float32)
    cos_s = xs @ wn                                   # s * cos_theta
    C = w.shape[1]
    onehot = jax.nn.one_hot(y, C, dtype=cos_s.dtype)
    logits = cos_s - s * m * onehot
    logp = jax.nn.log_softmax(logits, axis=1)
    q = (1.0 - ls) * onehot + ls / C
    return -jnp.mean(jnp.sum(q * logp, axis=1))


if __name__ == "__main__":
    # Small, deterministic example consistent with CosFace(feat_dim, num_class).
    feat_dim = 32
    num_class = 16
    batch = 8

    key = jax.random.PRNGKey(0)
    k_x, k_y, k_w = jax.random.split(key, 3)

    x = jax.random.normal(k_x, (batch, feat_dim), dtype=jnp.float32)
    y = jax.random.randint(k_y, (batch,), 0, num_class, dtype=jnp.int32)

    # xavier_normal_ init for w (feat_dim, num_class)
    xavier_std = (2.0 / (feat_dim + num_class)) ** 0.5
    w = xavier_std * jax.random.normal(k_w, (feat_dim, num_class), dtype=jnp.float32)

    loss = cosface_loss(x, y, w, s=64.0, m=0.35, label_smoothing=0.1)
    jax.block_until_ready(loss)

    ref = _reference_loss(x, y, w, 64.0, 0.35, 0.1)
    assert jnp.allclose(loss, ref, rtol=5e-2, atol=5e-2), (float(loss), float(ref))

    print("KERNEL_OK")
</pallas_src>

<mosaic_0001>
module attributes {stable_mosaic.version = 11 : i64} {
  func.func @kernel(%arg0: i32, %arg1: i32, %arg2: memref<8x32xf32, #tpu.memory_space<vmem>>, %arg3: memref<8x1xi32, #tpu.memory_space<vmem>>, %arg4: memref<32x128xbf16, #tpu.memory_space<vmem>>, %arg5: memref<2x128xf32, #tpu.memory_space<vmem>>, %arg6: memref<1x32xf32, #tpu.memory_space<vmem>>, %arg7: memref<8x1xf32, #tpu.memory_space<vmem>>, %arg8: memref<8x32xbf16, #tpu.memory_space<vmem>>, %arg9: memref<8x1xf32, #tpu.memory_space<vmem>>, %arg10: memref<8x1xf32, #tpu.memory_space<vmem>>, %arg11: memref<8x1xf32, #tpu.memory_space<vmem>>, %arg12: memref<8x1xf32, #tpu.memory_space<vmem>>) attributes {dimension_semantics = [#tpu.dimension_semantics<parallel>, #tpu.dimension_semantics<arbitrary>], iteration_bounds = array<i64: 1, 1>, scalar_prefetch = 0 : i64, scratch_operands = 5 : i64, tpu.core_type = #tpu.core_type<tc>, window_params = [{transform_indices = @transform_0, window_bounds = array<i64: 8, 32>}, {transform_indices = @transform_1, window_bounds = array<i64: 8, 1>}, {transform_indices = @transform_2, window_bounds = array<i64: 32, 128>}, {transform_indices = @transform_3, window_bounds = array<i64: 2, 128>}, {pipeline_mode = #tpu.pipeline_mode<synchronous>, transform_indices = @transform_4, window_bounds = array<i64: 1, 32>}, {transform_indices = @transform_5, window_bounds = array<i64: 8, 1>}]} {
    %c0_i32 = arith.constant 0 : i32
    %0 = arith.cmpi eq, %arg1, %c0_i32 : i32
    %1 = arith.extui %0 : i1 to i32
    %c0_i32_0 = arith.constant 0 : i32
    %2 = arith.cmpi ne, %1, %c0_i32_0 : i32
    scf.if %2 {
      %c0_31 = arith.constant 0 : index
      %c0_32 = arith.constant 0 : index
      %51 = vector.load %arg2[%c0_31, %c0_32] : memref<8x32xf32, #tpu.memory_space<vmem>>, vector<8x32xf32>
      %52 = arith.mulf %51, %51 : vector<8x32xf32>
      %cst_33 = arith.constant dense<0.000000e+00> : vector<8xf32>
      %53 = vector.multi_reduction <add>, %52, %cst_33 [1] : vector<8x32xf32> to vector<8xf32>
      %54 = vector.shape_cast %53 : vector<8xf32> to vector<8x1xf32>
      %cst_34 = arith.constant 1.000000e-24 : f32
      %55 = vector.broadcast %cst_34 : f32 to vector<8x1xf32>
      %56 = arith.maximumf %54, %55 : vector<8x1xf32>
      %57 = math.rsqrt %56 : vector<8x1xf32>
      %cst_35 = arith.constant 6.400000e+01 : f32
      %58 = vector.broadcast %cst_35 : f32 to vector<8x1xf32>
      %59 = arith.mulf %58, %57 : vector<8x1xf32>
      %60 = vector.broadcast %59 : vector<8x1xf32> to vector<8x32xf32>
      %61 = arith.mulf %51, %60 : vector<8x32xf32>
      %62 = arith.truncf %61 : vector<8x32xf32> to vector<8x32xbf16>
      %c0_36 = arith.constant 0 : index
      %c0_37 = arith.constant 0 : index
      %63 = vector.load %arg8[%c0_36, %c0_37] : memref<8x32xbf16, #tpu.memory_space<vmem>>, vector<8x32xbf16>
      tpu.vector_store %arg8[%c0_36, %c0_37], %62 {strides = array<i32>} : memref<8x32xbf16, #tpu.memory_space<vmem>>, vector<8x32xbf16>,
      %c0_38 = arith.constant 0 : index
      %c0_39 = arith.constant 0 : index
      %64 = vector.load %arg6[%c0_38, %c0_39] : memref<1x32xf32, #tpu.memory_space<vmem>>, vector<1x32xf32>
      %65 = vector.broadcast %64 : vector<1x32xf32> to vector<8x32xf32>
      %66 = arith.mulf %61, %65 : vector<8x32xf32>
      %cst_40 = arith.constant dense<0.000000e+00> : vector<8xf32>
      %67 = vector.multi_reduction <add>, %66, %cst_40 [1] : vector<8x32xf32> to vector<8xf32>
      %68 = vector.shape_cast %67 : vector<8xf32> to vector<8x1xf32>
      %cst_41 = arith.constant 2.240000e+01 : f32
      %69 = vector.broadcast %cst_41 : f32 to vector<8x1xf32>
      %70 = arith.subf %68, %69 : vector<8x1xf32>
      %c0_42 = arith.constant 0 : index
      %c0_43 = arith.constant 0 : index
      %71 = vector.load %arg12[%c0_42, %c0_43] : memref<8x1xf32, #tpu.memory_space<vmem>>, vector<8x1xf32>
      tpu.vector_store %arg12[%c0_42, %c0_43], %70 {strides = array<i32>} : memref<8x1xf32, #tpu.memory_space<vmem>>, vector<8x1xf32>,
      %cst_44 = arith.constant 0xFF800000 : f32
      %72 = vector.broadcast %cst_44 : f32 to vector<8x1xf32>
      %c0_45 = arith.constant 0 : index
      %c0_46 = arith.constant 0 : index
      %73 = vector.load %arg9[%c0_45, %c0_46] : memref<8x1xf32, #tpu.memory_space<vmem>>, vector<8x1xf32>
      tpu.vector_store %arg9[%c0_45, %c0_46], %72 {strides = array<i32>} : memref<8x1xf32, #tpu.memory_space<vmem>>, vector<8x1xf32>,
      %cst_47 = arith.constant 0.000000e+00 : f32
      %74 = vector.broadcast %cst_47 : f32 to vector<8x1xf32>
      %c0_48 = arith.constant 0 : index
      %c0_49 = arith.constant 0 : index
      %75 = vector.load %arg10[%c0_48, %c0_49] : memref<8x1xf32, #tpu.memory_space<vmem>>, vector<8x1xf32>
      tpu.vector_store %arg10[%c0_48, %c0_49], %74 {strides = array<i32>} : memref<8x1xf32, #tpu.memory_space<vmem>>, vector<8x1xf32>,
      %cst_50 = arith.constant 0.000000e+00 : f32
      %76 = vector.broadcast %cst_50 : f32 to vector<8x1xf32>
      %c0_51 = arith.constant 0 : index
      %c0_52 = arith.constant 0 : index
      %77 = vector.load %arg11[%c0_51, %c0_52] : memref<8x1xf32, #tpu.memory_space<vmem>>, vector<8x1xf32>
      tpu.vector_store %arg11[%c0_51, %c0_52], %76 {strides = array<i32>} : memref<8x1xf32, #tpu.memory_space<vmem>>, vector<8x1xf32>,
    } else {
    }
    %c0 = arith.constant 0 : index
    %c0_1 = arith.constant 0 : index
    %3 = vector.load %arg5[%c0, %c0_1] : memref<2x128xf32, #tpu.memory_space<vmem>>, vector<1x128xf32>
    %c0_2 = arith.constant 0 : index
    %c0_3 = arith.constant 0 : index
    %4 = vector.load %arg8[%c0_2, %c0_3] : memref<8x32xbf16, #tpu.memory_space<vmem>>, vector<8x32xbf16>
    %c0_4 = arith.constant 0 : index
    %c0_5 = arith.constant 0 : index
    %5 = vector.load %arg4[%c0_4, %c0_5] : memref<32x128xbf16, #tpu.memory_space<vmem>>, vector<32x128xbf16>
    %cst = arith.constant dense<0.000000e+00> : vector<8x128xf32>
    %6 = tpu.matmul %4, %5, %cst {dimension_numbers = #tpu.dot_dimension_numbers<[1], [0], [0], [1], [0, 0, 1, 1], [], []>} : vector<8x32xbf16>, vector<32x128xbf16>, vector<8x128xf32> -> vector<8x128xf32>
    %7 = vector.broadcast %3 : vector<1x128xf32> to vector<8x128xf32>
    %8 = arith.mulf %6, %7 : vector<8x128xf32>
    %9 = tpu.iota {dimensions = array<i32: 1>} : vector<1x128xi32>
    %c0_6 = arith.constant 0 : index
    %c0_7 = arith.constant 0 : index
    %10 = vector.load %arg3[%c0_6, %c0_7] : memref<8x1xi32, #tpu.memory_space<vmem>>, vector<8x1xi32>
    %c128_i32 = arith.constant 128 : i32
    %11 = arith.muli %arg1, %c128_i32 : i32
    %12 = vector.broadcast %11 : i32 to vector<8x1xi32>
    %13 = arith.subi %10, %12 : vector<8x1xi32>
    %14 = vector.broadcast %9 : vector<1x128xi32> to vector<8x128xi32>
    %15 = vector.broadcast %13 : vector<8x1xi32> to vector<8x128xi32>
    %16 = arith.cmpi eq, %14, %15 : vector<8x128xi32>
    %cst_8 = arith.constant 2.240000e+01 : f32
    %cst_9 = arith.constant 0.000000e+00 : f32
    %17 = vector.broadcast %cst_8 : f32 to vector<8x128xf32>
    %18 = vector.broadcast %cst_9 : f32 to vector<8x128xf32>
    %19 = arith.select %16, %17, %18 : vector<8x128xi1>, vector<8x128xf32>
    %20 = arith.subf %8, %19 : vector<8x128xf32>
    %c1 = arith.constant 1 : index
    %c0_10 = arith.constant 0 : index
    %21 = vector.load %arg5[%c1, %c0_10] : memref<2x128xf32, #tpu.memory_space<vmem>>, vector<1x128xf32>
    %22 = vector.broadcast %21 : vector<1x128xf32> to vector<8x128xf32>
    %23 = arith.addf %20, %22 : vector<8x128xf32>
    %cst_11 = arith.constant dense<0xFF800000> : vector<8xf32>
    %24 = vector.multi_reduction <maximumf>, %23, %cst_11 [1] : vector<8x128xf32> to vector<8xf32>
    %25 = vector.shape_cast %24 : vector<8xf32> to vector<8x1xf32>
    %c0_12 = arith.constant 0 : index
    %c0_13 = arith.constant 0 : index
    %26 = vector.load %arg9[%c0_12, %c0_13] : memref<8x1xf32, #tpu.memory_space<vmem>>, vector<8x1xf32>
    %27 = arith.maximumf %26, %25 : vector<8x1xf32>
    %c0_14 = arith.constant 0 : index
    %c0_15 = arith.constant 0 : index
    %28 = vector.load %arg9[%c0_14, %c0_15] : memref<8x1xf32, #tpu.memory_space<vmem>>, vector<8x1xf32>
    %29 = arith.subf %28, %27 : vector<8x1xf32>
    %30 = math.exp %29 : vector<8x1xf32>
    %31 = vector.broadcast %27 : vector<8x1xf32> to vector<8x128xf32>
    %32 = arith.subf %23, %31 : vector<8x128xf32>
    %33 = math.exp %32 : vector<8x128xf32>
    %c0_16 = arith.constant 0 : index
    %c0_17 = arith.constant 0 : index
    %34 = vector.load %arg10[%c0_16, %c0_17] : memref<8x1xf32, #tpu.memory_space<vmem>>, vector<8x1xf32>
    %35 = arith.mulf %30, %34 : vector<8x1xf32>
    %cst_18 = arith.constant dense<0.000000e+00> : vector<8xf32>
    %36 = vector.multi_reduction <add>, %33, %cst_18 [1] : vector<8x128xf32> to vector<8xf32>
    %37 = vector.shape_cast %36 : vector<8xf32> to vector<8x1xf32>
    %38 = arith.addf %35, %37 : vector<8x1xf32>
    %c0_19 = arith.constant 0 : index
    %c0_20 = arith.constant 0 : index
    %39 = vector.load %arg10[%c0_19, %c0_20] : memref<8x1xf32, #tpu.memory_space<vmem>>, vector<8x1xf32>
    tpu.vector_store %arg10[%c0_19, %c0_20], %38 {strides = array<i32>} : memref<8x1xf32, #tpu.memory_space<vmem>>, vector<8x1xf32>,
    %c0_21 = arith.constant 0 : index
    %c0_22 = arith.constant 0 : index
    %40 = vector.load %arg9[%c0_21, %c0_22] : memref<8x1xf32, #tpu.memory_space<vmem>>, vector<8x1xf32>
    tpu.vector_store %arg9[%c0_21, %c0_22], %27 {strides = array<i32>} : memref<8x1xf32, #tpu.memory_space<vmem>>, vector<8x1xf32>,
    %c0_23 = arith.constant 0 : index
    %c0_24 = arith.constant 0 : index
    %41 = vector.load %arg11[%c0_23, %c0_24] : memref<8x1xf32, #tpu.memory_space<vmem>>, vector<8x1xf32>
    %cst_25 = arith.constant 0.000000e+00 : f32
    %42 = vector.broadcast %cst_25 : f32 to vector<8x128xf32>
    %43 = arith.select %16, %20, %42 : vector<8x128xi1>, vector<8x128xf32>
    %cst_26 = arith.constant dense<0.000000e+00> : vector<8xf32>
    %44 = vector.multi_reduction <add>, %43, %cst_26 [1] : vector<8x128xf32> to vector<8xf32>
    %45 = vector.shape_cast %44 : vector<8xf32> to vector<8x1xf32>
    %46 = arith.addf %41, %45 : vector<8x1xf32>
    %c0_27 = arith.constant 0 : index
    %c0_28 = arith.constant 0 : index
    %47 = vector.load %arg11[%c0_27, %c0_28] : memref<8x1xf32, #tpu.memory_space<vmem>>, vector<8x1xf32>
    tpu.vector_store %arg11[%c0_27, %c0_28], %46 {strides = array<i32>} : memref<8x1xf32, #tpu.memory_space<vmem>>, vector<8x1xf32>,
    %c0_i32_29 = arith.constant 0 : i32
    %48 = arith.cmpi eq, %arg1, %c0_i32_29 : i32
    %49 = arith.extui %48 : i1 to i32
    %c0_i32_30 = arith.constant 0 : i32
    %50 = arith.cmpi ne, %49, %c0_i32_30 : i32
    scf.if %50 {
      %c0_31 = arith.constant 0 : index
      %c0_32 = arith.constant 0 : index
      %51 = vector.load %arg9[%c0_31, %c0_32] : memref<8x1xf32, #tpu.memory_space<vmem>>, vector<8x1xf32>
      %c0_33 = arith.constant 0 : index
      %c0_34 = arith.constant 0 : index
      %52 = vector.load %arg10[%c0_33, %c0_34] : memref<8x1xf32, #tpu.memory_space<vmem>>, vector<8x1xf32>
      %53 = math.log %52 : vector<8x1xf32>
      %54 = arith.addf %51, %53 : vector<8x1xf32>
      %c0_35 = arith.constant 0 : index
      %c0_36 = arith.constant 0 : index
      %55 = vector.load %arg11[%c0_35, %c0_36] : memref<8x1xf32, #tpu.memory_space<vmem>>, vector<8x1xf32>
      %cst_37 = arith.constant 0.899999976 : f32
      %56 = vector.broadcast %cst_37 : f32 to vector<8x1xf32>
      %57 = arith.mulf %56, %55 : vector<8x1xf32>
      %58 = arith.subf %54, %57 : vector<8x1xf32>
      %c0_38 = arith.constant 0 : index
      %c0_39 = arith.constant 0 : index
      %59 = vector.load %arg12[%c0_38, %c0_39] : memref<8x1xf32, #tpu.memory_space<vmem>>, vector<8x1xf32>
      %cst_40 = arith.constant 6.250000e-03 : f32
      %60 = vector.broadcast %cst_40 : f32 to vector<8x1xf32>
      %61 = arith.mulf %60, %59 : vector<8x1xf32>
      %62 = arith.subf %58, %61 : vector<8x1xf32>
      %c8_i32 = arith.constant 8 : i32
      %63 = arith.muli %arg0, %c8_i32 : i32
      %64 = tpu.iota {dimensions = array<i32: 0>} : vector<8x1xi32>
      %65 = vector.broadcast %63 : i32 to vector<8x1xi32>
      %66 = arith.addi %65, %64 : vector<8x1xi32>
      %c8_i32_41 = arith.constant 8 : i32
      %67 = vector.broadcast %c8_i32_41 : i32 to vector<8x1xi32>
      %68 = arith.cmpi slt, %66, %67 : vector<8x1xi32>
      %cst_42 = arith.constant 0.000000e+00 : f32
      %69 = vector.broadcast %cst_42 : f32 to vector<8x1xf32>
      %70 = arith.select %68, %62, %69 : vector<8x1xi1>, vector<8x1xf32>
      %cst_43 = arith.constant 8.000000e+00 : f32
      %71 = vector.broadcast %cst_43 : f32 to vector<8x1xf32>
      %72 = arith.divf %70, %71 : vector<8x1xf32>
      %c0_44 = arith.constant 0 : index
      %c0_45 = arith.constant 0 : index
      %73 = vector.load %arg7[%c0_44, %c0_45] : memref<8x1xf32, #tpu.memory_space<vmem>>, vector<8x1xf32>
      tpu.vector_store %arg7[%c0_44, %c0_45], %72 {strides = array<i32>} : memref<8x1xf32, #tpu.memory_space<vmem>>, vector<8x1xf32>,
    } else {
    }
    return
  }
  func.func @transform_0(%arg0: i32, %arg1: i32) -> (i32, i32) {
    %c0_i32 = arith.constant 0 : i32
    %c0_i32_0 = arith.constant 0 : i32
    return %arg0, %c0_i32 : i32, i32
  }
  func.func @transform_1(%arg0: i32, %arg1: i32) -> (i32, i32) {
    %c0_i32 = arith.constant 0 : i32
    %c0_i32_0 = arith.constant 0 : i32
    return %arg0, %c0_i32 : i32, i32
  }
  func.func @transform_2(%arg0: i32, %arg1: i32) -> (i32, i32) {
    %c0_i32 = arith.constant 0 : i32
    %c0_i32_0 = arith.constant 0 : i32
    return %c0_i32, %arg1 : i32, i32
  }
  func.func @transform_3(%arg0: i32, %arg1: i32) -> (i32, i32) {
    %c0_i32 = arith.constant 0 : i32
    %c0_i32_0 = arith.constant 0 : i32
    return %c0_i32, %arg1 : i32, i32
  }
  func.func @transform_4(%arg0: i32, %arg1: i32) -> (i32, i32) {
    %c0_i32 = arith.constant 0 : i32
    %c0_i32_0 = arith.constant 0 : i32
    %c0_i32_1 = arith.constant 0 : i32
    return %c0_i32, %c0_i32_0 : i32, i32
  }
  func.func @transform_5(%arg0: i32, %arg1: i32) -> (i32, i32) {
    %c0_i32 = arith.constant 0 : i32
    %c0_i32_0 = arith.constant 0 : i32
    return %arg0, %c0_i32 : i32, i32
  }
}

</mosaic_0001>

<bundles_post_ra>
// kernel: tpu_custom_call.1
= control target key start
LH: loop header
LB: loop body
LE: loop exit
PB: predicated region body
PF: predicated region fallthrough
CT: control target
= control target key end

     0   :  { %10 = vsyncpa [#allocation8], 0  ;;  %s271_s18 = smov [#allocation7]   ;;  %s340_s0 = inlined_call_operand.vmem [shape: f32[8,32], index: 0, kind: input, shape index: {}]   ;;  %s341_s1 = inlined_call_operand.vmem [shape: s32[8,1], index: 1, kind: input, shape index: {}]   ;;  %s342_s2 = inlined_call_operand.hbm [shape: bf16[32,128], index: 2, kind: input, shape index: {}]   ;;  %s343_s3 = inlined_call_operand.vmem [shape: f32[2,128], index: 3, kind: input, shape index: {}]   ;;  %s344_s4 = inlined_call_operand.vmem [shape: f32[1,32], index: 4, kind: input, shape index: {}]   ;;  %s345_s5 = inlined_call_operand.vmem [shape: f32[8,1], index: 5, kind: output, shape index: {}]  }
   0x1   :  { %s20_s19 = sshll.u32 %s271_s18, 4  ;;  %s21_s19 = int_to_ptr.vmem [resolvable:$true] %s20_s19 }
   0x2   :  { %s257_s20 = scalar_lea.vmem %s21_s19, 256  ;;  %p262_p1 = scmp.lt.s32.totalorder %s21_s19, %s21_s19 }
   0x3   :  { %p258_p0 = scmp.ne.s32.totalorder %s21_s19, %s257_s20  ;;  %p263_p2 = scmp.lt.s32.totalorder %s257_s20, %s257_s20 }
   0x5   :  { %p264_p3 = por %p263_p2, %p262_p1 }
   0x7   :  { %p265_p4 = pnand %p264_p3, %p258_p0 }
   0x9   :  { %268 = shalt.err (!%p265_p4)
}
   0xa   :  { %s272_s21 = smov 64   ;;  %s273_s22 = smov 4  }
   0xb   :  { %26 = dma.hbm_to_vmem [thread:$0]  %s342_s2, 256, %s21_s19, [#allocation8], %s272_s21, %s272_s21, %s273_s22  }
   0xc   :  { %269 = dma.done.wait [#allocation8], 256  }
   0xd   :  { %270 = vsyncadd [#allocation8], 4294967040  ;;  %v39_v0 = vld [vmem:[%s340_s0] sm:$0xff]  ;;  %vm41_vm0 = vcmask 261120   ;;  %v239_v3 = vld [vmem:[#allocation7 + $0x8] sm:$0xff]   ;;  %v274_v4 = vmov 0.0   ;;  %v136_v15 = vlaneseq }
   0xe   :  { %v40_v1 = vmul.f32 %v39_v0, %v39_v0  ;;  %222 = vmatprep.subr.bf16.mxu0 %v274_v4  ;;  %v240_v5 = vld [vmem:[#allocation7] sm:$0xff]   ;;  %vm275_vm1 = vmmov 0   ;;  %v276_v7 = vmov 0   ;;  %vm50_vm2 = vcmask 257024   ;;  %v217_v18 = vld [vmem:[%s343_s3] ss:$0 sm:$0xff] }
   0xf   :  { %223 = vmatpush3.bf16.msra.mxu0 %v239_v3  ;;  %226 = vmatprep.mubr.msk.bf16.mxu0 %vm275_vm1, %v274_v4  ;;  %v138_v6 = vld [vmem:[%s341_s1] sm:$0xff]  ;;  %vm64_vm3 = vcmask 7168   ;;  %v137_v16 = vand.u32 127, %v136_v15  ;;  %v277_v29 = vmov -inf  }
  0x10   :  { %v42_v2 = vsel %vm41_vm0, %v40_v1, 0.0  ;;  %224 = vmatprep.subr.bf16.mxu0 %v274_v4  ;;  %237 = vset.pattern.permute.xlu0 %v276_v7  ;;  %68 = vst.msk [vmem:[#allocation5] sm:$0xff] %vm64_vm3, %v274_v4  ;;  %67 = vst.msk [vmem:[#allocation4] sm:$0xff] %vm64_vm3, %v274_v4  ;;  %v218_v23 = vld [vmem:[%s343_s3 + $0x1] ss:$0 sm:$0xff] }
  0x11   :  { %43 = vadd.xlane.f32.xlu0 %v42_v2  ;;  %238 = vset.pattern.permute.xlu1 %v276_v7  ;;  %66 = vst.msk [vmem:[#allocation3] sm:$0xff] %vm64_vm3, %v277_v29  ;;  %v212_v40 = vld [vmem:[%s344_s4] ss:$0 sm:$0xff] }
  0x13   :  { %225 = vmatpush3.bf16.msra.mxu0 %v240_v5 }
  0x17   :  { %v177_v30 = vld [vmem:[#allocation5] sm:$0xff]  ;;  %v169_v46 = vld [vmem:[#allocation4] sm:$0xff] }
  0x18   :  { %v156_v31 = vld [vmem:[#allocation3] sm:$0xff] }
  0x27   :  { %143 = vperm.xlu0 %237, %v138_v6  }
  0x9a   :  { %v44_v8 = vpop.xlane.xlu0 %43 }
  0x9b   :  { %v45_v9 = vmax.f32 %v44_v8, 1e-24 }
  0x9d   :  { %241 = vrsqrt.f32 %v45_v9 }
  0xa2   :  { %v144_v17 = vpop.permute.xlu0 %143 }
  0xa3   :  { %vm145_vm4 = vcmp.eq.s32.totalorder %v137_v16, %v144_v17 }
  0xa4   :  { %v146_v20 = vsel %vm145_vm4, 22.4, %v274_v4 }
  0xaa   :  { %v242_v10 = vpop.eup %241 }
  0xab   :  { %v47_v11 = vmul.f32 64.0, %v242_v10 }
  0xad   :  { %v48_v12 = vmul.f32 %v47_v11, %v39_v0 }
  0xaf   :  { %v49_v13 = vpack.c.bf16 %v48_v12, %v48_v12  ;;  %v59_v42 = vmul.f32 %v212_v40, %v48_v12 }
  0xb1   :  { %51 = vst.msk [vmem:[#allocation2] sm:$0xf] %vm50_vm2, %v49_v13  ;;  %v60_v43 = vsel %vm41_vm0, %v59_v42, 0.0 }
  0xb8   :  { %v70_v14 = vld [vmem:[#allocation2] sm:$0xf] }
  0xb9   :  { %227 = vmatmul.mubr.msk.bf16.vlgmr.msra.gmra.mxu0 %vm41_vm0, %v70_v14 }
 0x179   :  { %v125_v19 = vpop.f32.mrf.mxu0 }
 0x17a   :  { %v135_v21 = vmul.f32 %v217_v18, %v125_v19 }
 0x17b   :  { %v228_v22 = vpop.f32.mrf.mxu0 }
 0x17c   :  { %v147_v24 = vsub.f32 %v135_v21, %v146_v20 }
 0x17d   :  { %v128_v25 = vpop.f32.mrf.mxu0 }
 0x17e   :  { %v178_v26 = vsel %vm145_vm4, %v147_v24, 0.0  ;;  %v153_v27 = vadd.f32 %v218_v23, %v147_v24 }
 0x17f   :  { %v229_v28 = vpop.f32.mrf.mxu0  ;;  %179 = vadd.xlane.f32.xlu0 %v178_v26 }
 0x180   :  { %154 = vmax.xlane.f32.xlu1 %v153_v27 }
 0x208   :  { %v180_v32 = vpop.xlane.xlu0 %179 }
 0x209   :  { %v181_v33 = vadd.f32 %v180_v32, %v177_v30  ;;  %v155_v34 = vpop.xlane.xlu1 %154 }
 0x20a   :  { %v157_v35 = vmax.f32 %v156_v31, %v155_v34 }
 0x20b   :  { %182 = vst.msk [vmem:[#allocation5] sm:$0xff] %vm64_vm3, %v181_v33 }
 0x20c   :  { %v158_v36 = vsub.f32 %v156_v31, %v157_v35  ;;  %176 = vst.msk [vmem:[#allocation3] sm:$0xff] %vm64_vm3, %v157_v35  ;;  %163 = vperm.xlu1 %238, %v157_v35  }
 0x20e   :  { %v159_v44 = vmul.f32 1.442695, %v158_v36 }
 0x212   :  { %v191_v54 = vld [vmem:[#allocation5] sm:$0xff] }
 0x213   :  { %v186_v56 = vld [vmem:[#allocation3] sm:$0xff]  ;;  %v192_v58 = vmul.f32 0.9, %v191_v54 }
 0x287   :  { %v164_v37 = vpop.permute.xlu1 %163 }
 0x288   :  { %v166_v38 = vsub.f32 %v153_v27, %v164_v37 }
 0x28a   :  { %v167_v39 = vmul.f32 1.442695, %v166_v38 }
 0x28c   :  { %243 = vpow2.f32 %v167_v39 }
 0x28d   :  { %245 = vpow2.f32 %v159_v44 }
 0x299   :  { %v244_v41 = vpop.eup %243 }
 0x29a   :  { %171 = vadd.xlane.f32.xlu1 %v244_v41  ;;  %v246_v45 = vpop.eup %245 }
 0x29b   :  { %v170_v47 = vmul.f32 %v246_v45, %v169_v46 }
 0x29e   :  { %61 = vadd.xlane.f32.xlu1 %v60_v43 }
 0x323   :  { %v172_v48 = vpop.xlane.xlu1 %171 }
 0x324   :  { %v173_v49 = vadd.f32 %v172_v48, %v170_v47 }
 0x326   :  { %175 = vst.msk [vmem:[#allocation4] sm:$0xff] %vm64_vm3, %v173_v49 }
 0x327   :  { %v62_v50 = vpop.xlane.xlu1 %61 }
 0x328   :  { %v213_v51 = vadd.f32 -22.4, %v62_v50 }
 0x32a   :  { %65 = vst.msk [vmem:[#allocation6] sm:$0xff] %vm64_vm3, %v213_v51 }
 0x32d   :  { %v187_v52 = vld [vmem:[#allocation4] sm:$0xff] }
 0x32e   :  { %247 = vlog2.f32 %v187_v52 }
 0x331   :  { %v194_v57 = vld [vmem:[#allocation6] sm:$0xff] }
 0x332   :  { %v195_v61 = vmul.f32 0.00625, %v194_v57 }
 0x33b   :  { %v248_v53 = vpop.eup %247 }
 0x33c   :  { %v189_v55 = vmul.f32 0.6931472, %v248_v53 }
 0x33e   :  { %v190_v59 = vadd.f32 %v189_v55, %v186_v56 }
 0x340   :  { %v193_v60 = vsub.f32 %v190_v59, %v192_v58 }
 0x342   :  { %v196_v62 = vsub.f32 %v193_v60, %v195_v61 }
 0x344   :  { %v205_v63 = vmul.f32 0.125, %v196_v62 }
 0x346   :  { %206 = vst.msk [vmem:[%s345_s5] sm:$0xff] %vm64_vm3, %v205_v63 }
 0x347   :  { %211 = vsyncpa [#allocation8], 1 }

</bundles_post_ra>
